<compile_context>
chip_gen: v6e
topology: v6e:2x2x1
jax: 0.10.0
libtpu: 0.0.40
codegen_flags: <defaults>
</compile_context>

<pallas_src>
import functools

import jax
import jax.numpy as jnp
from jax.experimental import pallas as pl
from jax.experimental.pallas import tpu as pltpu

LN_EPS = 1e-6  # torchvision ViT uses LayerNorm(eps=1e-6)


# ----------------------------------------------------------------------------- helpers
def _vmem_limit_bytes():
    """Generation-aware VMEM cap (leave ~20% headroom of per-core VMEM)."""
    try:
        cap = int(pltpu.get_tpu_info().vmem_capacity_bytes)
    except Exception:
        return None
    if cap < (32 << 20):
        return None
    return min(int(cap * 0.8), 100 << 20)


# ----------------------------------------------------------------------------- kernels
def _patch_embed_kernel(xp_ref, w_ref, base_ref, o_ref):
    # xp_ref: (1, S_pad, C*p*p) bf16 (rows >= P are zero), w_ref: (C*p*p, D) bf16
    # base_ref: (1, S_pad, D) f32 = pos+conv_b on patch rows, pos0+cls on the CLS row.
    tok = jnp.dot(xp_ref[0], w_ref[...], preferred_element_type=jnp.float32)
    o_ref[0] = base_ref[0] + tok          # single aligned full-tile store


def _encoder_stack_kernel(x_ref, mask_ref, ln1_g, ln1_b, wqkv_ref, bqkv_ref,
                          wo_ref, bo_ref, ln2_g, ln2_b, w1_ref, b1_ref,
                          w2_ref, b2_ref, fln_g, fln_b, hw_ref, hb_ref,
                          feat_ref, logit_ref, resid_ref, ctx_ref,
                          *, num_heads, cls_row, mlp_chunk):
    nb, s_pad, d = resid_ref.shape
    hd = d // num_heads
    m = w1_ref.shape[2]

    # Seed the resident residual stream at the first layer of each batch block.
    @pl.when(pl.program_id(1) == 0)
    def _():
        resid_ref[...] = x_ref[...]

    x2 = resid_ref[...].reshape(nb * s_pad, d)          # f32 residual stream

    def ln(v, g_ref, b_ref):
        mu = jnp.mean(v, axis=-1, keepdims=True)
        var = jnp.mean((v - mu) ** 2, axis=-1, keepdims=True)
        return (v - mu) * jax.lax.rsqrt(var + LN_EPS) * g_ref[0] + b_ref[0]

    # ---------------- pre-LN multi-head self attention -------------------------------
    xn = ln(x2, ln1_g, ln1_b).astype(jnp.bfloat16)
    qkv = (jnp.dot(xn, wqkv_ref[0], preferred_element_type=jnp.float32)
           + bqkv_ref[0]).astype(jnp.bfloat16)           # (nb*S, 3D); scale folded in Q
    kmask = mask_ref[...].reshape(1, 1, s_pad)           # precomputed additive key mask

    # Per-head loop writes ctx directly into a VMEM scratch (no stack/concat relayouts);
    # one head's (nb, S, S) logits tile is live at a time (v7x VMEM friendly).
    for h in range(num_heads):
        q_h = qkv[:, h * hd:(h + 1) * hd].reshape(nb, s_pad, hd)
        k_h = qkv[:, d + h * hd:d + (h + 1) * hd].reshape(nb, s_pad, hd)
        v_h = qkv[:, 2 * d + h * hd:2 * d + (h + 1) * hd].reshape(nb, s_pad, hd)
        lg = jnp.einsum('bqd,bkd->bqk', q_h, k_h,
                        preferred_element_type=jnp.float32) + kmask
        lg = lg - jnp.max(lg, axis=-1, keepdims=True)
        p = jnp.exp(lg)
        p = p * pl.reciprocal(jnp.sum(p, axis=-1, keepdims=True), approx=True)
        ctx_h = jnp.einsum('bqk,bkd->bqd', p.astype(jnp.bfloat16), v_h,
                           preferred_element_type=jnp.float32)
        ctx_ref[:, :, h * hd:(h + 1) * hd] = ctx_h.astype(ctx_ref.dtype)

    attn = (jnp.dot(ctx_ref[...].reshape(nb * s_pad, d), wo_ref[0],
                    preferred_element_type=jnp.float32) + bo_ref[0])
    x2 = x2 + attn

    # ---------------- pre-LN MLP (chunked along the expansion axis) ------------------
    yn = ln(x2, ln2_g, ln2_b).astype(jnp.bfloat16)
    chunk = mlp_chunk if (m % mlp_chunk == 0) else m
    acc = b2_ref[0].astype(jnp.float32)
    for c0 in range(0, m, chunk):
        h1 = (jnp.dot(yn, w1_ref[0, :, c0:c0 + chunk],
                      preferred_element_type=jnp.float32)
              + b1_ref[0, :, c0:c0 + chunk])
        # TODO(synk): torchvision nn.GELU is the exact erf form; tanh approximation here.
        h1 = jax.nn.gelu(h1, approximate=True).astype(jnp.bfloat16)
        acc = acc + jnp.dot(h1, w2_ref[0, c0:c0 + chunk, :],
                            preferred_element_type=jnp.float32)
    x2 = x2 + acc

    resid_ref[...] = x2.reshape(nb, s_pad, d)

    # ---------------- fused final LayerNorm + classification head (CLS row only) -----
    @pl.when(pl.program_id(1) == pl.num_programs(1) - 1)
    def _():
        cls = x2.reshape(nb, s_pad, d)[:, cls_row, :]                 # (nb, D)
        mu = jnp.mean(cls, axis=-1, keepdims=True)
        var = jnp.mean((cls - mu) ** 2, axis=-1, keepdims=True)
        hcls = (cls - mu) * jax.lax.rsqrt(var + LN_EPS) * fln_g[...] + fln_b[...]
        feat_ref[...] = hcls.reshape(1, nb, d).astype(feat_ref.dtype)
        logit_ref[...] = (jnp.dot(hcls.astype(jnp.bfloat16), hw_ref[...],
                                  preferred_element_type=jnp.float32)
                          + hb_ref[...]).reshape(1, nb, -1).astype(logit_ref.dtype)


# ----------------------------------------------------------------------------- wrappers
def patch_embed(xp, w_patch, base):
    n_pad, s_pad, kp = xp.shape
    d = base.shape[2]
    return pl.pallas_call(
        _patch_embed_kernel,
        out_shape=jax.ShapeDtypeStruct((n_pad, s_pad, d), jnp.float32),
        grid=(n_pad,),
        in_specs=[pl.BlockSpec((1, s_pad, kp), lambda b: (b, 0, 0)),
                  pl.BlockSpec((kp, d), lambda b: (0, 0)),
                  pl.BlockSpec((1, s_pad, d), lambda b: (0, 0, 0))],
        out_specs=pl.BlockSpec((1, s_pad, d), lambda b: (b, 0, 0)),
        compiler_params=pltpu.CompilerParams(dimension_semantics=("parallel",)),
    )(xp, w_patch, base)


def encoder_stack(seq, prep, *, num_heads, cls_row, nb, mlp_chunk):
    n_pad, s_pad, d = seq.shape
    n_blocks = n_pad // nb
    n_layers = prep['wqkv'].shape[0]
    m = prep['w1'].shape[2]
    classes = prep['head_w'].shape[1]

    kernel = functools.partial(_encoder_stack_kernel, num_heads=num_heads,
                               cls_row=cls_row, mlp_chunk=mlp_chunk)
    act = lambda b, l: (b, 0, 0)          # activation block: one fetch per batch block
    wgt = lambda b, l: (l, 0, 0)          # layer weights: streamed / double-buffered
    cst2 = lambda b, l: (0, 0)            # resident constants (mask, final LN, head)
    out3 = lambda b, l: (b, 0, 0)

    return pl.pallas_call(
        kernel,
        out_shape=(jax.ShapeDtypeStruct((n_blocks, nb, d), jnp.float32),
                   jax.ShapeDtypeStruct((n_blocks, nb, classes), jnp.float32)),
        grid=(n_blocks, n_layers),
        in_specs=[
            pl.BlockSpec((nb, s_pad, d), act),       # x (read only at layer 0)
            pl.BlockSpec((1, s_pad), cst2),          # additive key-pad mask
            pl.BlockSpec((1, 1, d), wgt),            # ln1 gamma
            pl.BlockSpec((1, 1, d), wgt),            # ln1 beta
            pl.BlockSpec((1, d, 3 * d), wgt),        # qkv weight (bf16, scale folded)
            pl.BlockSpec((1, 1, 3 * d), wgt),        # qkv bias
            pl.BlockSpec((1, d, d), wgt),            # out-proj weight (bf16)
            pl.BlockSpec((1, 1, d), wgt),            # out-proj bias
            pl.BlockSpec((1, 1, d), wgt),            # ln2 gamma
            pl.BlockSpec((1, 1, d), wgt),            # ln2 beta
            pl.BlockSpec((1, d, m), wgt),            # mlp w1 (bf16)
            pl.BlockSpec((1, 1, m), wgt),            # mlp b1
            pl.BlockSpec((1, m, d), wgt),            # mlp w2 (bf16)
            pl.BlockSpec((1, 1, d), wgt),            # mlp b2
            pl.BlockSpec((1, d), cst2),              # final LN gamma
            pl.BlockSpec((1, d), cst2),              # final LN beta
            pl.BlockSpec((d, classes), cst2),        # head weight (bf16)
            pl.BlockSpec((1, classes), cst2),        # head bias
        ],
        out_specs=(pl.BlockSpec((1, nb, d), out3),
                   pl.BlockSpec((1, nb, classes), out3)),
        scratch_shapes=[pltpu.VMEM((nb, s_pad, d), jnp.float32),    # residual stream
                        pltpu.VMEM((nb, s_pad, d), jnp.bfloat16)],  # attention ctx
        compiler_params=pltpu.CompilerParams(
            dimension_semantics=("parallel", "arbitrary"),
            vmem_limit_bytes=_vmem_limit_bytes()),
    )(seq, prep['mask'], prep['ln1_g'], prep['ln1_b'], prep['wqkv'], prep['bqkv'],
      prep['wo'], prep['bo'], prep['ln2_g'], prep['ln2_b'], prep['w1'], prep['b1'],
      prep['w2'], prep['b2'], prep['fln_g'], prep['fln_b'],
      prep['head_w'], prep['head_b'])


# ----------------------------------------------------------------------------- param prep
def prepare_params(params, *, heads, s_pad, p_cnt):
    """Stack per-layer params into (L, ...) arrays, cast matmul weights to bf16, fold
    1/sqrt(head_dim) into the Q columns, build the token "base" (patch rows first,
    CLS at row p_cnt) with conv bias folded in, and the additive key-pad mask."""
    hidden = params['conv_w'].shape[0]
    hd = hidden // heads
    scale = 1.0 / (hd ** 0.5)
    s_valid = p_cnt + 1

    pos = params['pos_embedding'][0]                      # (S, D)
    base = jnp.zeros((1, s_pad, hidden), jnp.float32)
    base = base.at[0, :p_cnt, :].set(pos[1:1 + p_cnt] + params['conv_b'][0])
    base = base.at[0, p_cnt, :].set(pos[0] + params['class_token'][0, 0])

    mask = jnp.where(jnp.arange(s_pad) < s_valid, 0.0, -1e30)
    mask = mask.astype(jnp.float32).reshape(1, s_pad)

    def stack(name):
        return jnp.stack([lp[name] for lp in params['layers']], axis=0)

    wqkv = stack('wqkv')                                  # (L, D, 3D)
    bqkv = stack('bqkv')                                  # (L, 1, 3D)
    wqkv = wqkv.at[:, :, :hidden].multiply(scale)
    bqkv = bqkv.at[:, :, :hidden].multiply(scale)

    return {
        'w_patch': params['conv_w'].reshape(hidden, -1).T.astype(jnp.bfloat16),
        'base': base,
        'mask': mask,
        'ln1_g': stack('ln1_g'), 'ln1_b': stack('ln1_b'),
        'wqkv': wqkv.astype(jnp.bfloat16), 'bqkv': bqkv,
        'wo': stack('wo').astype(jnp.bfloat16), 'bo': stack('bo'),
        'ln2_g': stack('ln2_g'), 'ln2_b': stack('ln2_b'),
        'w1': stack('w1').astype(jnp.bfloat16), 'b1': stack('b1'),
        'w2': stack('w2').astype(jnp.bfloat16), 'b2': stack('b2'),
        'fln_g': params['ln_g'], 'fln_b': params['ln_b'],
        'head_w': params['head_w'].astype(jnp.bfloat16),
        'head_b': params['head_b'],
    }


# ----------------------------------------------------------------------------- forward
def features_vit_forward(x, params, *, patch, heads, nb=None, mlp_chunk=1024):
    n, c, hgt, wid = x.shape
    hp, wp = hgt // patch, wid // patch
    p_cnt = hp * wp
    hidden = params['conv_w'].shape[0]
    classes = params['head_w'].shape[1]
    s_valid = p_cnt + 1
    s_pad = ((s_valid + 15) // 16) * 16      # bf16 sublane tile = 16 rows (197 -> 208)

    if nb is None:
        nb = min(4, n)                       # batch block; weights amortized over nb
    n_pad = ((n + nb - 1) // nb) * nb

    prep = prepare_params(params, heads=heads, s_pad=s_pad, p_cnt=p_cnt)

    # conv_proj (Conv2d, kernel=stride=patch) as an im2col matmul; reshape glue in JAX.
    kp = c * patch * patch
    xp = x.reshape(n, c, hp, patch, wp, patch).transpose(0, 2, 4, 1, 3, 5)
    xp = xp.reshape(n, p_cnt, kp)
    xp_pad = jnp.zeros((n_pad, s_pad, kp), jnp.bfloat16)
    xp_pad = xp_pad.at[:n, :p_cnt, :].set(xp.astype(jnp.bfloat16))

    seq = patch_embed(xp_pad, prep['w_patch'], prep['base'])
    feat, logits = encoder_stack(seq, prep, num_heads=heads, cls_row=p_cnt,
                                 nb=nb, mlp_chunk=mlp_chunk)
    h_last = feat.reshape(n_pad, hidden)[:n]
    out = logits.reshape(n_pad, classes)[:n]
    return h_last, out


# ----------------------------------------------------------------------------- params
def init_params(key, *, channels, patch, hidden, seq, mlp, layers, classes):
    keys = iter(jax.random.split(key, 16 + 8 * layers))

    def nrm(shape, scale=0.02):
        return (scale * jax.random.normal(next(keys), shape)).astype(jnp.float32)

    params = {
        'conv_w': nrm((hidden, channels, patch, patch)),
        'conv_b': nrm((1, hidden)),
        'class_token': nrm((1, 1, hidden)),
        'pos_embedding': nrm((1, seq, hidden)),
        'ln_g': jnp.ones((1, hidden), jnp.float32),
        'ln_b': jnp.zeros((1, hidden), jnp.float32),
        'head_w': nrm((hidden, classes)),
        'head_b': nrm((1, classes)),
        'layers': [],
    }
    for _ in range(layers):
        params['layers'].append({
            'ln1_g': jnp.ones((1, hidden), jnp.float32),
            'ln1_b': jnp.zeros((1, hidden), jnp.float32),
            'wqkv': nrm((hidden, 3 * hidden)),
            'bqkv': nrm((1, 3 * hidden)),
            'wo': nrm((hidden, hidden)),
            'bo': nrm((1, hidden)),
            'ln2_g': jnp.ones((1, hidden), jnp.float32),
            'ln2_b': jnp.zeros((1, hidden), jnp.float32),
            'w1': nrm((hidden, mlp)),
            'b1': nrm((1, mlp)),
            'w2': nrm((mlp, hidden)),
            'b2': nrm((1, hidden)),
        })
    return params


# ----------------------------------------------------------------------------- reference
def reference_forward(x, params, *, patch, heads):
    hi = jax.lax.Precision.HIGHEST
    n, c, hgt, wid = x.shape
    hp, wp = hgt // patch, wid // patch
    hidden = params['conv_w'].shape[0]
    hd = hidden // heads
    xp = x.reshape(n, c, hp, patch, wp, patch).transpose(0, 2, 4, 1, 3, 5)
    xp = xp.reshape(n * hp * wp, c * patch * patch)
    w_patch = params['conv_w'].reshape(hidden, c * patch * patch).T
    tok = (jnp.dot(xp, w_patch, precision=hi) + params['conv_b']).reshape(n, hp * wp, hidden)
    seq = jnp.concatenate([jnp.broadcast_to(params['class_token'], (n, 1, hidden)), tok], 1)
    seq = seq + params['pos_embedding']

    def ln(v, g, b):
        mu = v.mean(-1, keepdims=True)
        var = ((v - mu) ** 2).mean(-1, keepdims=True)
        return (v - mu) * jax.lax.rsqrt(var + LN_EPS) * g + b

    for lp in params['layers']:
        xn = ln(seq, lp['ln1_g'], lp['ln1_b'])
        qkv = jnp.einsum('nsd,de->nse', xn, lp['wqkv'], precision=hi) + lp['bqkv']
        q, k, v = (qkv[..., :hidden], qkv[..., hidden:2 * hidden], qkv[..., 2 * hidden:])
        split = lambda t: t.reshape(n, -1, heads, hd).transpose(0, 2, 1, 3)
        qh, kh, vh = split(q), split(k), split(v)
        logits = jnp.einsum('nhqd,nhkd->nhqk', qh, kh, precision=hi) / (hd ** 0.5)
        p = jax.nn.softmax(logits, axis=-1)
        ctx = jnp.einsum('nhqk,nhkd->nhqd', p, vh, precision=hi)
        ctx = ctx.transpose(0, 2, 1, 3).reshape(n, -1, hidden)
        seq = seq + jnp.einsum('nsd,de->nse', ctx, lp['wo'], precision=hi) + lp['bo']
        yn = ln(seq, lp['ln2_g'], lp['ln2_b'])
        h1 = jax.nn.gelu(jnp.einsum('nsd,dm->nsm', yn, lp['w1'], precision=hi) + lp['b1'],
                         approximate=True)
        seq = seq + jnp.einsum('nsm,md->nsd', h1, lp['w2'], precision=hi) + lp['b2']
    h_last = ln(seq, params['ln_g'], params['ln_b'])[:, 0]
    out = jnp.dot(h_last, params['head_w'], precision=hi) + params['head_b']
    return h_last, out


# ----------------------------------------------------------------------------- main
if __name__ == "__main__":
    import numpy as np

    BATCH, CHANNELS, IMG = 2, 3, 32
    PATCH, HIDDEN, HEADS, MLP, LAYERS, CLASSES = 16, 32, 4, 64, 2, 10
    SEQ = (IMG // PATCH) ** 2 + 1  # patches + CLS token

    key = jax.random.PRNGKey(0)
    xkey, pkey = jax.random.split(key)
    x = jax.random.normal(xkey, (BATCH, CHANNELS, IMG, IMG), jnp.float32)
    params = init_params(pkey, channels=CHANNELS, patch=PATCH, hidden=HIDDEN,
                         seq=SEQ, mlp=MLP, layers=LAYERS, classes=CLASSES)

    h_last, out = features_vit_forward(x, params, patch=PATCH, heads=HEADS)
    jax.block_until_ready((h_last, out))

    h_ref, out_ref = reference_forward(x, params, patch=PATCH, heads=HEADS)
    assert h_last.shape == (BATCH, HIDDEN) and out.shape == (BATCH, CLASSES)
    np.testing.assert_allclose(np.asarray(h_last), np.asarray(h_ref), rtol=2e-2, atol=2e-2)
    np.testing.assert_allclose(np.asarray(out), np.asarray(out_ref), rtol=2e-2, atol=2e-2)
    print("KERNEL_OK")
</pallas_src>

<mosaic_0001>
module attributes {stable_mosaic.version = 11 : i64} {
  func.func @_patch_embed_kernel(%arg0: i32, %arg1: memref<1x16x768xbf16, #tpu.memory_space<vmem>>, %arg2: memref<768x32xbf16, #tpu.memory_space<vmem>>, %arg3: memref<1x16x32xf32, #tpu.memory_space<vmem>>, %arg4: memref<1x16x32xf32, #tpu.memory_space<vmem>>) attributes {dimension_semantics = [#tpu.dimension_semantics<parallel>], iteration_bounds = array<i64: 2>, scalar_prefetch = 0 : i64, scratch_operands = 0 : i64, tpu.core_type = #tpu.core_type<tc>, window_params = [{transform_indices = @transform_0, window_bounds = array<i64: 1, 16, 768>}, {pipeline_mode = #tpu.pipeline_mode<synchronous>, transform_indices = @transform_1, window_bounds = array<i64: 768, 32>}, {pipeline_mode = #tpu.pipeline_mode<synchronous>, transform_indices = @transform_2, window_bounds = array<i64: 1, 16, 32>}, {transform_indices = @transform_3, window_bounds = array<i64: 1, 16, 32>}]} {
    %c0 = arith.constant 0 : index
    %c0_0 = arith.constant 0 : index
    %c0_1 = arith.constant 0 : index
    %0 = vector.load %arg1[%c0, %c0_0, %c0_1] : memref<1x16x768xbf16, #tpu.memory_space<vmem>>, vector<1x16x768xbf16>
    %1 = vector.shape_cast %0 : vector<1x16x768xbf16> to vector<16x768xbf16>
    %c0_2 = arith.constant 0 : index
    %c0_3 = arith.constant 0 : index
    %2 = vector.load %arg2[%c0_2, %c0_3] : memref<768x32xbf16, #tpu.memory_space<vmem>>, vector<768x32xbf16>
    %cst = arith.constant dense<0.000000e+00> : vector<16x32xf32>
    %3 = tpu.matmul %1, %2, %cst {dimension_numbers = #tpu.dot_dimension_numbers<[1], [0], [0], [1], [0, 0, 1, 1], [], []>} : vector<16x768xbf16>, vector<768x32xbf16>, vector<16x32xf32> -> vector<16x32xf32>
    %c0_4 = arith.constant 0 : index
    %c0_5 = arith.constant 0 : index
    %c0_6 = arith.constant 0 : index
    %4 = vector.load %arg3[%c0_4, %c0_5, %c0_6] : memref<1x16x32xf32, #tpu.memory_space<vmem>>, vector<1x16x32xf32>
    %5 = vector.shape_cast %4 : vector<1x16x32xf32> to vector<16x32xf32>
    %6 = arith.addf %5, %3 : vector<16x32xf32>
    %c0_7 = arith.constant 0 : index
    %c0_8 = arith.constant 0 : index
    %c0_9 = arith.constant 0 : index
    %7 = vector.load %arg4[%c0_7, %c0_8, %c0_9] : memref<1x16x32xf32, #tpu.memory_space<vmem>>, vector<1x16x32xf32>
    %8 = vector.shape_cast %7 : vector<1x16x32xf32> to vector<16x32xf32>
    %9 = vector.shape_cast %6 : vector<16x32xf32> to vector<1x16x32xf32>
    tpu.vector_store %arg4[%c0_7, %c0_8, %c0_9], %9 {strides = array<i32>} : memref<1x16x32xf32, #tpu.memory_space<vmem>>, vector<1x16x32xf32>,
    return
  }
  func.func @transform_0(%arg0: i32) -> (i32, i32, i32) {
    %c0_i32 = arith.constant 0 : i32
    %c0_i32_0 = arith.constant 0 : i32
    %c0_i32_1 = arith.constant 0 : i32
    return %arg0, %c0_i32, %c0_i32_0 : i32, i32, i32
  }
  func.func @transform_1(%arg0: i32) -> (i32, i32) {
    %c0_i32 = arith.constant 0 : i32
    %c0_i32_0 = arith.constant 0 : i32
    %c0_i32_1 = arith.constant 0 : i32
    return %c0_i32, %c0_i32_0 : i32, i32
  }
  func.func @transform_2(%arg0: i32) -> (i32, i32, i32) {
    %c0_i32 = arith.constant 0 : i32
    %c0_i32_0 = arith.constant 0 : i32
    %c0_i32_1 = arith.constant 0 : i32
    %c0_i32_2 = arith.constant 0 : i32
    return %c0_i32, %c0_i32_0, %c0_i32_1 : i32, i32, i32
  }
  func.func @transform_3(%arg0: i32) -> (i32, i32, i32) {
    %c0_i32 = arith.constant 0 : i32
    %c0_i32_0 = arith.constant 0 : i32
    %c0_i32_1 = arith.constant 0 : i32
    return %arg0, %c0_i32, %c0_i32_0 : i32, i32, i32
  }
}

</mosaic_0001>

<bundles_post_ra>
// kernel: tpu_custom_call.1
= control target key start
LH: loop header
LB: loop body
LE: loop exit
PB: predicated region body
PF: predicated region fallthrough
CT: control target
= control target key end

     0   :  { %8 = vsyncpa [#allocation3], 0  ;;  %s1372_s0 = inlined_call_operand.vmem [shape: bf16[2,16,768], index: 0, kind: input, shape index: {}]   ;;  %s1373_s1 = inlined_call_operand.vmem [shape: bf16[768,32], index: 1, kind: input, shape index: {}]   ;;  %s1374_s2 = inlined_call_operand.vmem [shape: f32[1,16,32], index: 2, kind: input, shape index: {}]   ;;  %s1375_s3 = inlined_call_operand.hbm [shape: f32[2,16,32], index: 3, kind: output, shape index: {}]  }
   0x1   :  { %10 = vsyncpa [#allocation3 + $0x1], 0  ;;  %s1112_s12 = smov 0   ;;  %s1114_s13 = smov 0  }
   0x2   :  { %s1116_s14 = smov 0   ;;  %s1118_s15 = smov 0  }
   0x3 LB: > { %s1133_s16 = sadd.s32 4294967295, %s1087_s15   ;;  %s796_s17 = sadd.s32 4294967294, %s1087_s15   ;;  %s1087_s15 = sphi %s1118_s15, %s1381_s15   ;;  %s1083_s14 = sphi %s1116_s14, %s1380_s14   ;;  %s1079_s13 = sphi %s1114_s13, %s1379_s13   ;;  %s1075_s12 = sphi %s1112_s12, %s1378_s12  }
   0x4   : > { %s1137_s18 = sadd.s32 1, %s1087_s15   ;;  %s91_s19 = sadd.s32 1, %s1083_s14 }
   0x5   : > { %s88_s20 = ssub.s32 %s1087_s15, %s1137_s18  ;;  %p101_p0 = scmp.ne.s32.totalorder %s1083_s14, %s1079_s13 }
   0x6   : > { %p89_p1 = scmp.eq.s32.totalorder %s88_s20, 0  ;;  %p102_p2 = scmp.eq.s32.totalorder %s1133_s16, 1 }
   0x7   : > { %p107_p3 = scmp.ne.s32.totalorder %s1079_s13, %s1075_s12  ;;  %p108_p4 = scmp.eq.s32.totalorder %s796_s17, 1 }
   0x8   : > { %s1148_s21 = scalar_select %p89_p1, %s1083_s14, %s91_s19  }
   0x9   : > { %p1150_p5 = por %p102_p2, %p101_p0  ;;  %p1154_p6 = por %p108_p4, %p107_p3 }
   0xa   : > { %p799_p7 = scmp.ge.s32.totalorder %s1087_s15, 1  ;;  %p140_p8 = scmp.lt.s32.totalorder %s1087_s15, 3 }
   0xc   : > { %p141_p9 = pnand %p799_p7, %p140_p8 }
   0xd   : > { %p164_p10 = scmp.lt.s32.totalorder (!%p141_p9), %s1133_s16, 1  ;;  %s161_s10 = sand.u32 (!%p141_p9), 1, %s1079_s13  }
   0xe   : > { %144 = sbr.rel (%p141_p9) target bundleno = 304 (0x130), region = 32  ;;  %s861_s19 = sshll.u32 (!%p141_p9), %s1133_s16, 8 }
   0xf   : > { %s1328_s29 = scalar_lea.hbm (!%p141_p9), %s1375_s3, %s861_s19  ;;  %s1089_s4 = smov (!%p141_p9), [#allocation2]  }
  0x13   : > { %v970_v0 = vld [vmem:[%s1373_s1 + $0x78] sm:$0xff]   ;;  %v974_v4 = vld [vmem:[%s1373_s1 + $0x70] sm:$0xff]   ;;  %v978_v8 = vld [vmem:[%s1373_s1 + $0x68] sm:$0xff]   ;;  %s165_s5 = scalar_select %p164_p10, %s1133_s16, 1  ;;  %vm717_vm0 = vcmask 261120  }
  0x14   : > { %v971_v1 = vld [vmem:[%s1373_s1 + $0xf8] sm:$0xff]   ;;  %862 = vmatprep.subr.bf16.mxu0 %v970_v0  ;;  %v975_v5 = vld [vmem:[%s1373_s1 + $0xf0] sm:$0xff]   ;;  %v979_v9 = vld [vmem:[%s1373_s1 + $0xe8] sm:$0xff]   ;;  %s1332_s16 = scalar_lea.sflag [#allocation3], %s161_s10 }
  0x15   : > { %v972_v2 = vld [vmem:[%s1373_s1 + $0x38] sm:$0xff]   ;;  %884 = vmatprep.subr.bf16.mxu1 %v971_v1  ;;  %v976_v6 = vld [vmem:[%s1373_s1 + $0x30] sm:$0xff]   ;;  %v980_v10 = vld [vmem:[%s1373_s1 + $0x28] sm:$0xff]   ;;  %s928_s20 = smul.u32 48, %s165_s5  ;;  %s1031_s5 = sshll.u32 %s1089_s4, 4  ;;  %s1032_s5 = int_to_ptr.vmem [resolvable:$false] %s1031_s5 }
  0x16   : > { %v973_v3 = vld [vmem:[%s1373_s1 + $0xb8] sm:$0xff]   ;;  %863 = vmatpush3.bf16.msra.mxu0 %v972_v2  ;;  %v977_v7 = vld [vmem:[%s1373_s1 + $0xb0] sm:$0xff]   ;;  %v981_v11 = vld [vmem:[%s1373_s1 + $0xa8] sm:$0xff]   ;;  %s1033_s6 = scalar_lea.vmem %s1032_s5, 512 }
  0x17   : > { %885 = vmatpush3.bf16.msra.mxu1 %v973_v3  ;;  %864 = vmatprep.subr.bf16.mxu0 %v974_v4  ;;  %v982_v12 = vld [vmem:[%s1373_s1 + $0x60] sm:$0xff]   ;;  %v986_v16 = vld [vmem:[%s1373_s1 + $0x58] sm:$0xff]   ;;  %v990_v20 = vld [vmem:[%s1373_s1 + $0x50] sm:$0xff]   ;;  %s1255_s7 = scalar_lea.vmem %s1372_s0, %s928_s20 }
  0x18   : > { %886 = vmatprep.subr.bf16.mxu1 %v975_v5  ;;  %v983_v13 = vld [vmem:[%s1373_s1 + $0xe0] sm:$0xff]   ;;  %v987_v17 = vld [vmem:[%s1373_s1 + $0xd8] sm:$0xff]   ;;  %v991_v21 = vld [vmem:[%s1373_s1 + $0xd0] sm:$0xff]  }
  0x19   : > { %v984_v14 = vld [vmem:[%s1373_s1 + $0x20] sm:$0xff]   ;;  %v988_v18 = vld [vmem:[%s1373_s1 + $0x18] sm:$0xff]   ;;  %v992_v22 = vld [vmem:[%s1373_s1 + $0x10] sm:$0xff]  }
  0x1a   : > { %865 = vmatpush3.bf16.msra.mxu0 %v976_v6  ;;  %v985_v15 = vld [vmem:[%s1373_s1 + $0xa0] sm:$0xff]   ;;  %v989_v19 = vld [vmem:[%s1373_s1 + $0x98] sm:$0xff]   ;;  %v993_v23 = vld [vmem:[%s1373_s1 + $0x90] sm:$0xff]  }
  0x1b   : > { %887 = vmatpush3.bf16.msra.mxu1 %v977_v7  ;;  %866 = vmatprep.subr.bf16.mxu0 %v978_v8  ;;  %v994_v24 = vld [vmem:[%s1373_s1 + $0x48] sm:$0xff]   ;;  %v998_v28 = vld [vmem:[%s1373_s1 + $0x40] sm:$0xff]   ;;  %v1008_v36 = vld [vmem:[%s1373_s1 + $0x178] sm:$0xff]  }
  0x1c   : > { %888 = vmatprep.subr.bf16.mxu1 %v979_v9  ;;  %v995_v25 = vld [vmem:[%s1373_s1 + $0xc8] sm:$0xff]   ;;  %v999_v29 = vld [vmem:[%s1373_s1 + $0xc0] sm:$0xff]   ;;  %v1009_v37 = vld [vmem:[%s1373_s1 + $0x138] sm:$0xff]  }
  0x1d   : > { %v996_v26 = vld [vmem:[%s1373_s1 + $0x8] sm:$0xff]   ;;  %v1000_v30 = vld [vmem:[%s1373_s1] sm:$0xff]   ;;  %v1010_v38 = vld [vmem:[%s1373_s1 + $0x170] sm:$0xff]  }
  0x1e   : > { %867 = vmatpush3.bf16.msra.mxu0 %v980_v10  ;;  %v997_v27 = vld [vmem:[%s1373_s1 + $0x88] sm:$0xff]   ;;  %v1001_v31 = vld [vmem:[%s1373_s1 + $0x80] sm:$0xff]   ;;  %v1011_v39 = vld [vmem:[%s1373_s1 + $0x130] sm:$0xff]  }
  0x1f   : > { %889 = vmatpush3.bf16.msra.mxu1 %v981_v11  ;;  %868 = vmatprep.subr.bf16.mxu0 %v982_v12  ;;  %v1002_v32 = vld [vmem:[%s1255_s7] ss:$24 sps:$4 sm:$0xff]   ;;  %v1004_v33 = vld [vmem:[%s1255_s7 + $0x4] ss:$24 sps:$4 sm:$0xff]   ;;  %v1012_v40 = vld [vmem:[%s1373_s1 + $0x168] sm:$0xff]  }
  0x20   : > { %890 = vmatprep.subr.bf16.mxu1 %v983_v13  ;;  %v1005_v34 = vld [vmem:[%s1255_s7 + $0x8] ss:$24 sps:$4 sm:$0xff]   ;;  %v1007_v35 = vld [vmem:[%s1255_s7 + $0xc] ss:$24 sps:$4 sm:$0xff]   ;;  %622 = vmatprep.mubr.bf16.mxu0 %v1004_v33  ;;  %v1016_v44 = vld [vmem:[%s1373_s1 + $0x158] sm:$0xff]  }
  0x21   : > { %663 = vmatprep.mubr.bf16.mxu1 %v1007_v35  ;;  %v1013_v41 = vld [vmem:[%s1373_s1 + $0x128] sm:$0xff]   ;;  %v1014_v42 = vld [vmem:[%s1373_s1 + $0x160] sm:$0xff]   ;;  %v1017_v45 = vld [vmem:[%s1373_s1 + $0x118] sm:$0xff]  }
  0x22   : > { %869 = vmatpush3.bf16.msra.mxu0 %v984_v14  ;;  %v1015_v43 = vld [vmem:[%s1373_s1 + $0x120] sm:$0xff]   ;;  %v1018_v46 = vld [vmem:[%s1373_s1 + $0x150] sm:$0xff]   ;;  %v1020_v49 = vld [vmem:[%s1373_s1 + $0x148] sm:$0xff]  }
  0x23   : > { %891 = vmatpush3.bf16.msra.mxu1 %v985_v15  ;;  %870 = vmatprep.subr.bf16.mxu0 %v986_v16  ;;  %v1026_v47 = vld [vmem:[%s1255_s7 + $0x14] ss:$24 sps:$4 sm:$0xff]   ;;  %v1022_v51 = vld [vmem:[%s1373_s1 + $0x140] sm:$0xff]   ;;  %v1024_v53 = vld [vmem:[%s1255_s7 + $0x10] ss:$24 sps:$4 sm:$0xff]   ;;  %s800_s7 = sshll.u32 %s161_s10, 4 }
  0x24   : > { %892 = vmatprep.subr.bf16.mxu1 %v987_v17  ;;  %v1019_v48 = vld [vmem:[%s1373_s1 + $0x110] sm:$0xff]   ;;  %v1021_v50 = vld [vmem:[%s1373_s1 + $0x108] sm:$0xff]   ;;  %v1023_v52 = vld [vmem:[%s1373_s1 + $0x100] sm:$0xff]   ;;  %s163_s20 = scalar_lea.vmem [#allocation2], %s800_s7 }
  0x25   : > { %v713_v6 = vld [vmem:[%s1374_s2] sm:$0xff]  ;;  %s734_s24 = sshll.u32 %s163_s20, 4  ;;  %v714_v13 = vld [vmem:[%s1374_s2 + $0x8] sm:$0xff]  ;;  %s1330_s24 = int_to_ptr.vmem [resolvable:$true] %s734_s24 }
  0x26   : > { %871 = vmatpush3.bf16.msra.mxu0 %v988_v18  ;;  %s1027_s30 = scalar_lea.vmem %s1330_s24, 256  ;;  %p1034_p0 = scmp.lt.s32.totalorder %s1330_s24, %s1032_s5 }
  0x27   : > { %893 = vmatpush3.bf16.msra.mxu1 %v989_v19  ;;  %872 = vmatprep.subr.bf16.mxu0 %v990_v20  ;;  %p1028_p11 = scmp.ne.s32.totalorder %s1330_s24, %s1027_s30  ;;  %p1035_p1 = scmp.lt.s32.totalorder %s1033_s6, %s1027_s30 }
  0x28   : > { %894 = vmatprep.subr.bf16.mxu1 %v991_v21 }
  0x29   : > { %p1029_p12 = pnand %p1028_p11, %p1150_p5  ;;  %p1036_p2 = por %p1035_p1, %p1034_p0 }
  0x2a   : > { %873 = vmatpush3.bf16.msra.mxu0 %v992_v22 }
  0x2b   : > { %895 = vmatpush3.bf16.msra.mxu1 %v993_v23  ;;  %874 = vmatprep.subr.bf16.mxu0 %v994_v24  ;;  %p1030_p13 = pneg %p1029_p12 }
  0x2c   : > { %896 = vmatprep.subr.bf16.mxu1 %v995_v25 }
  0x2d   : > { %p1037_p3 = pnand %p1036_p2, %p1030_p13 }
  0x2e   : > { %875 = vmatpush3.bf16.msra.mxu0 %v996_v26 }
  0x2f   : > { %897 = vmatpush3.bf16.msra.mxu1 %v997_v27  ;;  %876 = vmatprep.subr.bf16.mxu0 %v998_v28 }
  0x30   : > { %898 = vmatprep.subr.bf16.mxu1 %v999_v29 }
  0x32   : > { %877 = vmatpush3.bf16.msra.mxu0 %v1000_v30 }
  0x33   : > { %899 = vmatpush3.bf16.msra.mxu1 %v1001_v31  ;;  %906 = vmatprep.subr.bf16.mxu0 %v1008_v36 }
  0x35   : > { %623 = vmatmul.mubr.bf16.vlgmr.msra.gmra.mxu0 %v1002_v32 }
  0x36   : > { %664 = vmatmul.mubr.bf16.vlgmr.msra.gmra.mxu1 %v1005_v34  ;;  %907 = vmatpush3.bf16.msra.mxu0 %v1009_v37 }
  0x37   : > { %908 = vmatprep.subr.bf16.mxu0 %v1010_v38  ;;  %704 = vmatprep.mubr.bf16.mxu0 %v1026_v47 }
  0x3a   : > { %909 = vmatpush3.bf16.msra.mxu0 %v1011_v39 }
  0x3b   : > { %910 = vmatprep.subr.bf16.mxu0 %v1012_v40 }
  0x3e   : > { %911 = vmatpush3.bf16.msra.mxu0 %v1013_v41 }
  0x3f   : > { %912 = vmatprep.subr.bf16.mxu0 %v1014_v42 }
  0x42   : > { %913 = vmatpush3.bf16.msra.mxu0 %v1015_v43 }
  0x43   : > { %914 = vmatprep.subr.bf16.mxu0 %v1016_v44 }
  0x46   : > { %915 = vmatpush3.bf16.msra.mxu0 %v1017_v45 }
  0x47   : > { %916 = vmatprep.subr.bf16.mxu0 %v1018_v46 }
  0x4a   : > { %917 = vmatpush3.bf16.msra.mxu0 %v1019_v48 }
  0x4b   : > { %918 = vmatprep.subr.bf16.mxu0 %v1020_v49 }
  0x4e   : > { %919 = vmatpush3.bf16.msra.mxu0 %v1021_v50 }
  0x4f   : > { %920 = vmatprep.subr.bf16.mxu0 %v1022_v51 }
  0x52   : > { %921 = vmatpush3.bf16.msra.mxu0 %v1023_v52 }
  0x55   : > { %705 = vmatmul.mubr.bf16.vlgmr.msra.gmra.mxu0 %v1024_v53 }
  0xf5   : > { %v878_v54 = vpop.f32.mrf.mxu0 }
  0xf6   : > { %v900_v55 = vpop.f32.mrf.mxu1 }
  0xf7   : > { %v879_v56 = vpop.f32.mrf.mxu0 }
  0xf8   : > { %v901_v57 = vpop.f32.mrf.mxu1  ;;  %v880_v61 = vadd.f32 %v879_v56, %v878_v54 }
  0xf9   : > { %v881_v58 = vpop.f32.mrf.mxu0  ;;  %v902_v62 = vadd.f32 %v901_v57, %v900_v55 }
  0xfa   : > { %v903_v59 = vpop.f32.mrf.mxu1 }
  0xfb   : > { %v882_v60 = vpop.f32.mrf.mxu0  ;;  %v666_v2 = vadd.f32 %v902_v62, %v880_v61 }
  0xfc   : > { %v904_v63 = vpop.f32.mrf.mxu1  ;;  %v883_v3 = vadd.f32 %v882_v60, %v881_v58 }
  0xfd   : > { %v905_v4 = vadd.f32 %v904_v63, %v903_v59 }
  0xff   : > { %v669_v10 = vadd.f32 %v905_v4, %v883_v3 }
 0x115   : > { %v922_v0 = vpop.f32.mrf.mxu0 }
 0x117   : > { %v923_v1 = vpop.f32.mrf.mxu0 }
 0x118   : > { %v924_v5 = vadd.f32 %v923_v1, %v922_v0 }
 0x119   : > { %v925_v7 = vpop.f32.mrf.mxu0 }
 0x11a   : > { %v707_v8 = vadd.f32 %v924_v5, %v666_v2 }
 0x11b   : > { %v926_v9 = vpop.f32.mrf.mxu0 }
 0x11c   : > { %v715_v11 = vadd.f32 %v713_v6, %v707_v8  ;;  %v927_v12 = vadd.f32 %v926_v9, %v925_v7 }
 0x11e   : > { %718 = vst.msk [vmem:[%s163_s20] sm:$0xff] %vm717_vm0, %v715_v11  ;;  %v710_v14 = vadd.f32 %v927_v12, %v669_v10 }
 0x120   : > { %v716_v15 = vadd.f32 %v714_v13, %v710_v14 }
 0x122   : > { %719 = vst.msk [vmem:[%s163_s20 + $0x8] sm:$0xff] %vm717_vm0, %v716_v15 }
 0x123   : > { %1040 = shalt.err (!%p1037_p3)
}
 0x124   : > { %s1041_s8 = scalar_lea.hbm %s1328_s29, 256  ;;  %s1045_s7 = scalar_lea.hbm %s1375_s3, 512 }
 0x125   : > { %p1042_p4 = scmp.ne.s32.totalorder %s1328_s29, %s1041_s8  ;;  %p1046_p9 = scmp.lt.s32.totalorder %s1328_s29, %s1375_s3 }
 0x126   : > { %p1047_p10 = scmp.lt.s32.totalorder %s1045_s7, %s1041_s8 }
 0x127   : > { %p1043_p7 = pnand %p1042_p4, %p1150_p5 }
 0x128   : > { %p1048_p11 = por %p1047_p10, %p1046_p9 }
 0x129   : > { %p1044_p8 = pneg %p1043_p7 }
 0x12b   : > { %p1049_p12 = pnand %p1048_p11, %p1044_p8 }
 0x12d   : > { %1052 = shalt.err (!%p1049_p12)
}
 0x12e   : > { %s1090_s19 = smov 128   ;;  %s1091_s20 = smov 8  }
 0x12f   : > { %929 = dma.vmem_to_hbm [thread:$0]  (%p1150_p5), %s1330_s24, 256, %s1328_s29, %s1332_s16, %s1090_s19, %s1090_s19, %s1091_s20  }
 0x130 PF: > { %p935_p13 = scmp.ge.s32.totalorder %s1087_s15, 2  ;;  %s749_s25 = sand.u32 1, %s1075_s12  }
 0x131   : > { %s750_s26 = scalar_lea.sflag [#allocation3], %s749_s25 }
 0x132   : > { %p932_p0 = pnand %p935_p13, %p1154_p6 }
 0x134   : > { %p933_p1 = pneg %p932_p0 }
 0x136   : > { %1070 = dma.done.wait (%p933_p1), %s750_s26, 256  }
 0x137   : > { %1072 = vsyncadd (%p933_p1), %s750_s26, 4294967040  ;;  %p13_p2 = scmp.ge.s32.totalorder %s1137_s18, 4   ;;  %s1378_s12 = smov %s1079_s13 }
 0x138   : > { %s1379_s13 = smov %s1083_s14  ;;  %s1380_s14 = smov %s1148_s21 }
 0x139   : > { %s1381_s15 = smov %s1137_s18  ;;  %15 = sbr.rel (!%p13_p2) target bundleno = 3 (0x3), region = 67 }
 0x13e   :  { %755 = vsyncpa [#allocation3], 1 }
 0x13f   :  { %757 = vsyncpa [#allocation3 + $0x1], 1 }

</bundles_post_ra>
